<compile_context>
chip_gen: v7x
topology: tpu7x:2x2x1
jax: 0.10.0
libtpu: 0.0.40
codegen_flags: <defaults>
</compile_context>

<pallas_src>
import jax
import jax.numpy as jnp
from jax.experimental import pallas as pl
from jax.experimental.pallas import tpu as pltpu

_MIB = 1024 * 1024


def _round_up(x, m):
    return ((x + m - 1) // m) * m


def _vmem_budget():
    """Per-generation VMEM tiling budget + scoped limit (bytes)."""
    try:
        cap = int(pltpu.get_tpu_info().vmem_capacity_bytes)
    except Exception:  # interpret mode / unknown chip
        cap = 64 * _MIB                      # conservative (v7x-sized) default
    cap = max(cap, 32 * _MIB)
    budget = min(int(cap * 0.625), 80 * _MIB)   # 40 MiB on v7x, 80 MiB on v5e/v6e
    limit = max(32 * _MIB, min(cap - 8 * _MIB, 100 * _MIB))
    return budget, limit


# ----------------------------- kernels -----------------------------

def _resident_kernel(x_ref, w1_ref, b1_ref, w2_ref, b2_ref, o_ref):
    """Both weight matrices VMEM-resident; one batch tile per grid step."""
    x = x_ref[...]
    if x.dtype != w1_ref.dtype:
        x = x.astype(w1_ref.dtype)   # cast in-kernel: keeps HBM x traffic native
    h = jnp.dot(x, w1_ref[...], preferred_element_type=jnp.float32)
    h = jnp.maximum(h + b1_ref[...], 0.0)
    y = jnp.dot(h.astype(w2_ref.dtype), w2_ref[...],
                preferred_element_type=jnp.float32)
    o_ref[...] = jnp.maximum(y + b2_ref[...], 0.0).astype(o_ref.dtype)


def _tiled_kernel(x_ref, w1_ref, b1_ref, w2_ref, b2_ref, o_ref, acc_ref):
    """Weight-tiled fallback: grid = (batch tiles, hidden-dim tiles).

    Each step builds one column tile of h = relu(x @ W1 + b1) and immediately
    contracts it into an f32 accumulator for y; finalized on the last tile.
    """
    n = pl.program_id(1)

    @pl.when(n == 0)
    def _():
        acc_ref[...] = jnp.zeros_like(acc_ref)

    x = x_ref[...]
    if x.dtype != w1_ref.dtype:
        x = x.astype(w1_ref.dtype)
    h = jnp.dot(x, w1_ref[...], preferred_element_type=jnp.float32)
    h = jnp.maximum(h + b1_ref[...], 0.0)
    acc_ref[...] += jnp.dot(h.astype(w2_ref.dtype), w2_ref[...],
                            preferred_element_type=jnp.float32)

    @pl.when(n == pl.num_programs(1) - 1)
    def _():
        o_ref[...] = jnp.maximum(acc_ref[...] + b2_ref[...], 0.0).astype(o_ref.dtype)


# ----------------------------- wrapper -----------------------------

def make_aggregation(w1, b1, w2, b2, *, compute_dtype=None,
                     force_weight_tiling=False, single_buffer_weights=True,
                     tm_max=2048):
    """Returns a jitted apply(x) = relu(relu(x @ W1^T + b1) @ W2^T + b2).

    w1, w2 are in PyTorch Linear layout [out, in].  Weights are transposed,
    lane-padded and cast exactly once here (hoisted out of the per-call path).
    """
    w1 = jnp.asarray(w1); b1 = jnp.asarray(b1)
    w2 = jnp.asarray(w2); b2 = jnp.asarray(b2)
    D_out, D_in = w1.shape
    if D_out != D_in or w2.shape != (D_out, D_in):
        raise ValueError("_Aggregation requires output_dim == input_dim "
                         f"(got w1={w1.shape}, w2={w2.shape})")

    cdtype = jnp.dtype(compute_dtype) if compute_dtype is not None else w1.dtype
    w_item = jnp.dtype(cdtype).itemsize

    # Lane-dense feature padding only when D is not already 128-aligned.
    Dp = max(128, _round_up(D_in, 128))

    def _pad_w(a):                              # a is [in, out]
        a = a.astype(cdtype)
        if a.shape == (Dp, Dp):
            return a
        return jnp.zeros((Dp, Dp), cdtype).at[:a.shape[0], :a.shape[1]].set(a)

    def _pad_b(b):
        b = b.astype(jnp.float32)[None, :]
        if b.shape == (1, Dp):
            return b
        return jnp.zeros((1, Dp), jnp.float32).at[:, :b.shape[1]].set(b)

    # One-time weight prep (transpose to [in, out], pad, cast).
    w1p = _pad_w(w1.T)
    b1p = _pad_b(b1)
    w2p = _pad_w(w2.T)
    b2p = _pad_b(b2)

    budget, vmem_limit = _vmem_budget()

    w_bufs = 1 if single_buffer_weights else 2
    resident_bytes = w_bufs * 2 * Dp * Dp * w_item + 4 * Dp * 4   # W1+W2 + f32 biases
    use_tiled = force_weight_tiling or (resident_bytes > int(budget * 0.8))

    TN = 128
    if use_tiled:
        # Hidden-dim tile: multiple of 128 dividing Dp (prefer < Dp so the
        # accumulation axis is real whenever Dp > 128).
        for cand in (512, 384, 256, 128):
            if Dp % cand == 0 and (cand < Dp or Dp == 128):
                TN = cand
                break

    w_pipe = {"pipeline_mode": pl.Buffered(1)} if single_buffer_weights else {}

    @jax.jit
    def apply(x):
        B, d_in = x.shape
        if d_in != D_in:
            raise ValueError(f"expected x[..., {D_in}], got {x.shape}")
        x_item = jnp.dtype(x.dtype).itemsize
        o_item = x_item
        mult = max(8, 32 // min(x_item, w_item))   # sublane packing of narrowest dtype

        x_in = x if D_in == Dp else jnp.pad(x, ((0, 0), (0, Dp - D_in)))

        if not use_tiled:
            # x/out tiles double-buffered + f32 h + its cast copy.
            per_row = 2 * Dp * x_item + 2 * Dp * o_item + Dp * 4 + Dp * w_item
            tm = (budget - resident_bytes) // per_row
            tm = max(mult, min(tm_max, (tm // mult) * mult))
            tm = min(tm, _round_up(B, mult))
            grid_m = pl.cdiv(B, tm)
            # Batch-parallel only pays off once x/out traffic dominates the
            # (per-core duplicated) weight stream.
            batch_sem = "parallel" if grid_m >= 4 else "arbitrary"

            cost = pl.CostEstimate(
                flops=4 * B * Dp * Dp, transcendentals=0,
                bytes_accessed=int(B * Dp * (x_item + o_item)
                                   + 2 * Dp * Dp * w_item + 8 * Dp))

            out = pl.pallas_call(
                _resident_kernel,
                out_shape=jax.ShapeDtypeStruct((B, Dp), x.dtype),
                grid=(grid_m,),
                in_specs=[
                    pl.BlockSpec((tm, Dp), lambda i: (i, 0)),            # x tile
                    pl.BlockSpec((Dp, Dp), lambda i: (0, 0), **w_pipe),  # W1 resident
                    pl.BlockSpec((1, Dp), lambda i: (0, 0)),             # b1
                    pl.BlockSpec((Dp, Dp), lambda i: (0, 0), **w_pipe),  # W2 resident
                    pl.BlockSpec((1, Dp), lambda i: (0, 0)),             # b2
                ],
                out_specs=pl.BlockSpec((tm, Dp), lambda i: (i, 0)),
                compiler_params=pltpu.CompilerParams(
                    dimension_semantics=(batch_sem,),
                    vmem_limit_bytes=vmem_limit),
                cost_estimate=cost,
            )(x_in, w1p, b1p, w2p, b2p)
        else:
            fixed = 4 * Dp * TN * w_item + 4 * TN * 4 + 4 * Dp * 4
            per_row = (2 * Dp * x_item + 2 * Dp * o_item + Dp * 4
                       + TN * 4 + TN * w_item)
            tm = max(budget - fixed, per_row * mult) // per_row
            tm = max(mult, min(tm_max, (tm // mult) * mult))
            tm = min(tm, _round_up(B, mult))
            grid_m = pl.cdiv(B, tm)
            grid_n = Dp // TN
            batch_sem = "parallel" if grid_m >= 4 else "arbitrary"

            cost = pl.CostEstimate(
                flops=4 * B * Dp * Dp, transcendentals=0,
                bytes_accessed=int(B * Dp * (x_item + o_item)
                                   + grid_m * 2 * Dp * Dp * w_item + 8 * Dp))

            out = pl.pallas_call(
                _tiled_kernel,
                out_shape=jax.ShapeDtypeStruct((B, Dp), x.dtype),
                grid=(grid_m, grid_n),
                in_specs=[
                    pl.BlockSpec((tm, Dp), lambda i, n: (i, 0)),   # x tile (constant over n)
                    pl.BlockSpec((Dp, TN), lambda i, n: (0, n)),   # W1 column tile
                    pl.BlockSpec((1, TN), lambda i, n: (0, n)),    # b1 tile
                    pl.BlockSpec((TN, Dp), lambda i, n: (n, 0)),   # W2 row tile
                    pl.BlockSpec((1, Dp), lambda i, n: (0, 0)),    # b2
                ],
                out_specs=pl.BlockSpec((tm, Dp), lambda i, n: (i, 0)),
                scratch_shapes=[pltpu.VMEM((tm, Dp), jnp.float32)],
                compiler_params=pltpu.CompilerParams(
                    dimension_semantics=(batch_sem, "arbitrary"),
                    vmem_limit_bytes=vmem_limit),
                cost_estimate=cost,
            )(x_in, w1p, b1p, w2p, b2p)

        if Dp != D_out:
            out = out[:, :D_out]
        return out

    return apply


if __name__ == "__main__":
    # Small shapes consistent with the module: batch=8, input_dim=output_dim=32.
    B, D = 8, 32
    key = jax.random.PRNGKey(0)
    k_x, k_w1, k_b1, k_w2, k_b2 = jax.random.split(key, 5)

    bound = 1.0 / (D ** 0.5)   # mimic PyTorch Linear default init range
    x = jax.random.normal(k_x, (B, D), dtype=jnp.float32)
    w1 = jax.random.uniform(k_w1, (D, D), jnp.float32, -bound, bound)  # [out, in]
    b1 = jax.random.uniform(k_b1, (D,), jnp.float32, -bound, bound)
    w2 = jax.random.uniform(k_w2, (D, D), jnp.float32, -bound, bound)  # [out, in]
    b2 = jax.random.uniform(k_b2, (D,), jnp.float32, -bound, bound)

    def ref_fn(x, w1, b1, w2, b2):
        return jnp.maximum(jnp.maximum(x @ w1.T + b1, 0.0) @ w2.T + b2, 0.0)

    ref = ref_fn(x, w1, b1, w2, b2)

    # --- Test 1: f32, VMEM-resident-weights path (the common case). ---------
    sbw = True
    try:
        agg = make_aggregation(w1, b1, w2, b2, single_buffer_weights=sbw)
        out = jax.block_until_ready(agg(x))
    except Exception:
        # Fallback if this JAX build rejects pipeline_mode=pl.Buffered(1).
        sbw = False
        agg = make_aggregation(w1, b1, w2, b2, single_buffer_weights=sbw)
        out = jax.block_until_ready(agg(x))
    assert out.shape == (B, D), out.shape
    # Tolerance covers MXU default-precision matmul vs. the XLA reference.
    assert jnp.allclose(out, ref, atol=2e-2, rtol=2e-2), \
        float(jnp.max(jnp.abs(out - ref)))

    # --- Test 2: opt-in bf16 MXU compute path (f32 params / activations). ---
    agg_bf16 = make_aggregation(w1, b1, w2, b2, compute_dtype=jnp.bfloat16,
                                single_buffer_weights=sbw)
    out_bf = jax.block_until_ready(agg_bf16(x))
    assert out_bf.shape == (B, D), out_bf.shape
    assert jnp.allclose(out_bf, ref, atol=1e-1, rtol=1e-1), \
        float(jnp.max(jnp.abs(out_bf - ref)))

    # --- Test 3: weight-tiled fallback path (forced at a small aligned D). --
    D2, B2 = 256, 48
    bound2 = 1.0 / (D2 ** 0.5)
    kk = jax.random.split(jax.random.PRNGKey(1), 5)
    x2 = jax.random.normal(kk[0], (B2, D2), dtype=jnp.float32)
    w1b = jax.random.uniform(kk[1], (D2, D2), jnp.float32, -bound2, bound2)
    b1b = jax.random.uniform(kk[2], (D2,), jnp.float32, -bound2, bound2)
    w2b = jax.random.uniform(kk[3], (D2, D2), jnp.float32, -bound2, bound2)
    b2b = jax.random.uniform(kk[4], (D2,), jnp.float32, -bound2, bound2)
    agg_tiled = make_aggregation(w1b, b1b, w2b, b2b, force_weight_tiling=True)
    out2 = jax.block_until_ready(agg_tiled(x2))
    ref2 = ref_fn(x2, w1b, b1b, w2b, b2b)
    assert out2.shape == (B2, D2), out2.shape
    assert jnp.allclose(out2, ref2, atol=2e-2, rtol=2e-2), \
        float(jnp.max(jnp.abs(out2 - ref2)))

    print("KERNEL_OK")
</pallas_src>

<mosaic_0001>
module attributes {stable_mosaic.version = 11 : i64} {
  func.func @_resident_kernel(%arg0: i32, %arg1: memref<8x128xf32, #tpu.memory_space<vmem>>, %arg2: memref<128x128xf32, #tpu.memory_space<vmem>>, %arg3: memref<1x128xf32, #tpu.memory_space<vmem>>, %arg4: memref<128x128xf32, #tpu.memory_space<vmem>>, %arg5: memref<1x128xf32, #tpu.memory_space<vmem>>, %arg6: memref<8x128xf32, #tpu.memory_space<vmem>>) attributes {dimension_semantics = [#tpu.dimension_semantics<arbitrary>], iteration_bounds = array<i64: 1>, scalar_prefetch = 0 : i64, scratch_operands = 0 : i64, tpu.core_type = #tpu.core_type<tc>, window_params = [{transform_indices = @transform_0, window_bounds = array<i64: 8, 128>}, {pipeline_mode = #tpu.pipeline_mode<synchronous>, transform_indices = @transform_1, window_bounds = array<i64: 128, 128>}, {pipeline_mode = #tpu.pipeline_mode<synchronous>, transform_indices = @transform_2, window_bounds = array<i64: 1, 128>}, {pipeline_mode = #tpu.pipeline_mode<synchronous>, transform_indices = @transform_3, window_bounds = array<i64: 128, 128>}, {pipeline_mode = #tpu.pipeline_mode<synchronous>, transform_indices = @transform_4, window_bounds = array<i64: 1, 128>}, {transform_indices = @transform_5, window_bounds = array<i64: 8, 128>}]} {
    %c0 = arith.constant 0 : index
    %c0_0 = arith.constant 0 : index
    %0 = vector.load %arg1[%c0, %c0_0] : memref<8x128xf32, #tpu.memory_space<vmem>>, vector<8x128xf32>
    %c0_1 = arith.constant 0 : index
    %c0_2 = arith.constant 0 : index
    %1 = vector.load %arg2[%c0_1, %c0_2] : memref<128x128xf32, #tpu.memory_space<vmem>>, vector<128x128xf32>
    %cst = arith.constant dense<0.000000e+00> : vector<8x128xf32>
    %2 = tpu.matmul %0, %1, %cst {dimension_numbers = #tpu.dot_dimension_numbers<[1], [0], [0], [1], [0, 0, 1, 1], [], []>} : vector<8x128xf32>, vector<128x128xf32>, vector<8x128xf32> -> vector<8x128xf32>
    %c0_3 = arith.constant 0 : index
    %c0_4 = arith.constant 0 : index
    %3 = vector.load %arg3[%c0_3, %c0_4] : memref<1x128xf32, #tpu.memory_space<vmem>>, vector<1x128xf32>
    %4 = vector.broadcast %3 : vector<1x128xf32> to vector<8x128xf32>
    %5 = arith.addf %2, %4 : vector<8x128xf32>
    %cst_5 = arith.constant 0.000000e+00 : f32
    %6 = vector.broadcast %cst_5 : f32 to vector<8x128xf32>
    %7 = arith.maximumf %5, %6 : vector<8x128xf32>
    %c0_6 = arith.constant 0 : index
    %c0_7 = arith.constant 0 : index
    %8 = vector.load %arg4[%c0_6, %c0_7] : memref<128x128xf32, #tpu.memory_space<vmem>>, vector<128x128xf32>
    %cst_8 = arith.constant dense<0.000000e+00> : vector<8x128xf32>
    %9 = tpu.matmul %7, %8, %cst_8 {dimension_numbers = #tpu.dot_dimension_numbers<[1], [0], [0], [1], [0, 0, 1, 1], [], []>} : vector<8x128xf32>, vector<128x128xf32>, vector<8x128xf32> -> vector<8x128xf32>
    %c0_9 = arith.constant 0 : index
    %c0_10 = arith.constant 0 : index
    %10 = vector.load %arg5[%c0_9, %c0_10] : memref<1x128xf32, #tpu.memory_space<vmem>>, vector<1x128xf32>
    %11 = vector.broadcast %10 : vector<1x128xf32> to vector<8x128xf32>
    %12 = arith.addf %9, %11 : vector<8x128xf32>
    %cst_11 = arith.constant 0.000000e+00 : f32
    %13 = vector.broadcast %cst_11 : f32 to vector<8x128xf32>
    %14 = arith.maximumf %12, %13 : vector<8x128xf32>
    %c0_12 = arith.constant 0 : index
    %c0_13 = arith.constant 0 : index
    %15 = vector.load %arg6[%c0_12, %c0_13] : memref<8x128xf32, #tpu.memory_space<vmem>>, vector<8x128xf32>
    tpu.vector_store %arg6[%c0_12, %c0_13], %14 {strides = array<i32>} : memref<8x128xf32, #tpu.memory_space<vmem>>, vector<8x128xf32>,
    return
  }
  func.func @transform_0(%arg0: i32) -> (i32, i32) {
    %c0_i32 = arith.constant 0 : i32
    %c0_i32_0 = arith.constant 0 : i32
    return %arg0, %c0_i32 : i32, i32
  }
  func.func @transform_1(%arg0: i32) -> (i32, i32) {
    %c0_i32 = arith.constant 0 : i32
    %c0_i32_0 = arith.constant 0 : i32
    %c0_i32_1 = arith.constant 0 : i32
    return %c0_i32, %c0_i32_0 : i32, i32
  }
  func.func @transform_2(%arg0: i32) -> (i32, i32) {
    %c0_i32 = arith.constant 0 : i32
    %c0_i32_0 = arith.constant 0 : i32
    %c0_i32_1 = arith.constant 0 : i32
    return %c0_i32, %c0_i32_0 : i32, i32
  }
  func.func @transform_3(%arg0: i32) -> (i32, i32) {
    %c0_i32 = arith.constant 0 : i32
    %c0_i32_0 = arith.constant 0 : i32
    %c0_i32_1 = arith.constant 0 : i32
    return %c0_i32, %c0_i32_0 : i32, i32
  }
  func.func @transform_4(%arg0: i32) -> (i32, i32) {
    %c0_i32 = arith.constant 0 : i32
    %c0_i32_0 = arith.constant 0 : i32
    %c0_i32_1 = arith.constant 0 : i32
    return %c0_i32, %c0_i32_0 : i32, i32
  }
  func.func @transform_5(%arg0: i32) -> (i32, i32) {
    %c0_i32 = arith.constant 0 : i32
    %c0_i32_0 = arith.constant 0 : i32
    return %arg0, %c0_i32 : i32, i32
  }
}

module attributes {stable_mosaic.version = 11 : i64} {
  func.func @_resident_kernel(%arg0: i32, %arg1: memref<8x128xf32, #tpu.memory_space<vmem>>, %arg2: memref<128x128xf32, #tpu.memory_space<vmem>>, %arg3: memref<1x128xf32, #tpu.memory_space<vmem>>, %arg4: memref<128x128xf32, #tpu.memory_space<vmem>>, %arg5: memref<1x128xf32, #tpu.memory_space<vmem>>, %arg6: memref<8x128xf32, #tpu.memory_space<vmem>>) attributes {dimension_semantics = [#tpu.dimension_semantics<arbitrary>], iteration_bounds = array<i64: 1>, scalar_prefetch = 0 : i64, scratch_operands = 0 : i64, tpu.core_type = #tpu.core_type<tc>, window_params = [{transform_indices = @transform_0, window_bounds = array<i64: 8, 128>}, {pipeline_mode = #tpu.pipeline_mode<synchronous>, transform_indices = @transform_1, window_bounds = array<i64: 128, 128>}, {pipeline_mode = #tpu.pipeline_mode<synchronous>, transform_indices = @transform_2, window_bounds = array<i64: 1, 128>}, {pipeline_mode = #tpu.pipeline_mode<synchronous>, transform_indices = @transform_3, window_bounds = array<i64: 128, 128>}, {pipeline_mode = #tpu.pipeline_mode<synchronous>, transform_indices = @transform_4, window_bounds = array<i64: 1, 128>}, {transform_indices = @transform_5, window_bounds = array<i64: 8, 128>}]} {
    %c0 = arith.constant 0 : index
    %c0_0 = arith.constant 0 : index
    %0 = vector.load %arg1[%c0, %c0_0] : memref<8x128xf32, #tpu.memory_space<vmem>>, vector<8x128xf32>
    %c0_1 = arith.constant 0 : index
    %c0_2 = arith.constant 0 : index
    %1 = vector.load %arg2[%c0_1, %c0_2] : memref<128x128xf32, #tpu.memory_space<vmem>>, vector<128x128xf32>
    %cst = arith.constant dense<0.000000e+00> : vector<8x128xf32>
    %2 = tpu.matmul %0, %1, %cst {dimension_numbers = #tpu.dot_dimension_numbers<[1], [0], [0], [1], [0, 0, 1, 1], [], []>} : vector<8x128xf32>, vector<128x128xf32>, vector<8x128xf32> -> vector<8x128xf32>
    %c0_3 = arith.constant 0 : index
    %c0_4 = arith.constant 0 : index
    %3 = vector.load %arg3[%c0_3, %c0_4] : memref<1x128xf32, #tpu.memory_space<vmem>>, vector<1x128xf32>
    %4 = vector.broadcast %3 : vector<1x128xf32> to vector<8x128xf32>
    %5 = arith.addf %2, %4 : vector<8x128xf32>
    %cst_5 = arith.constant 0.000000e+00 : f32
    %6 = vector.broadcast %cst_5 : f32 to vector<8x128xf32>
    %7 = arith.maximumf %5, %6 : vector<8x128xf32>
    %c0_6 = arith.constant 0 : index
    %c0_7 = arith.constant 0 : index
    %8 = vector.load %arg4[%c0_6, %c0_7] : memref<128x128xf32, #tpu.memory_space<vmem>>, vector<128x128xf32>
    %cst_8 = arith.constant dense<0.000000e+00> : vector<8x128xf32>
    %9 = tpu.matmul %7, %8, %cst_8 {dimension_numbers = #tpu.dot_dimension_numbers<[1], [0], [0], [1], [0, 0, 1, 1], [], []>} : vector<8x128xf32>, vector<128x128xf32>, vector<8x128xf32> -> vector<8x128xf32>
    %c0_9 = arith.constant 0 : index
    %c0_10 = arith.constant 0 : index
    %10 = vector.load %arg5[%c0_9, %c0_10] : memref<1x128xf32, #tpu.memory_space<vmem>>, vector<1x128xf32>
    %11 = vector.broadcast %10 : vector<1x128xf32> to vector<8x128xf32>
    %12 = arith.addf %9, %11 : vector<8x128xf32>
    %cst_11 = arith.constant 0.000000e+00 : f32
    %13 = vector.broadcast %cst_11 : f32 to vector<8x128xf32>
    %14 = arith.maximumf %12, %13 : vector<8x128xf32>
    %c0_12 = arith.constant 0 : index
    %c0_13 = arith.constant 0 : index
    %15 = vector.load %arg6[%c0_12, %c0_13] : memref<8x128xf32, #tpu.memory_space<vmem>>, vector<8x128xf32>
    tpu.vector_store %arg6[%c0_12, %c0_13], %14 {strides = array<i32>} : memref<8x128xf32, #tpu.memory_space<vmem>>, vector<8x128xf32>,
    return
  }
  func.func @transform_0(%arg0: i32) -> (i32, i32) {
    %c0_i32 = arith.constant 0 : i32
    %c0_i32_0 = arith.constant 0 : i32
    return %arg0, %c0_i32 : i32, i32
  }
  func.func @transform_1(%arg0: i32) -> (i32, i32) {
    %c0_i32 = arith.constant 0 : i32
    %c0_i32_0 = arith.constant 0 : i32
    %c0_i32_1 = arith.constant 0 : i32
    return %c0_i32, %c0_i32_0 : i32, i32
  }
  func.func @transform_2(%arg0: i32) -> (i32, i32) {
    %c0_i32 = arith.constant 0 : i32
    %c0_i32_0 = arith.constant 0 : i32
    %c0_i32_1 = arith.constant 0 : i32
    return %c0_i32, %c0_i32_0 : i32, i32
  }
  func.func @transform_3(%arg0: i32) -> (i32, i32) {
    %c0_i32 = arith.constant 0 : i32
    %c0_i32_0 = arith.constant 0 : i32
    %c0_i32_1 = arith.constant 0 : i32
    return %c0_i32, %c0_i32_0 : i32, i32
  }
  func.func @transform_4(%arg0: i32) -> (i32, i32) {
    %c0_i32 = arith.constant 0 : i32
    %c0_i32_0 = arith.constant 0 : i32
    %c0_i32_1 = arith.constant 0 : i32
    return %c0_i32, %c0_i32_0 : i32, i32
  }
  func.func @transform_5(%arg0: i32) -> (i32, i32) {
    %c0_i32 = arith.constant 0 : i32
    %c0_i32_0 = arith.constant 0 : i32
    return %arg0, %c0_i32 : i32, i32
  }
}

</mosaic_0001>

<bundles_post_ra>
// kernel: apply.1
= control target key start
LH: loop header
LB: loop body
LE: loop exit
PB: predicated region body
PF: predicated region fallthrough
CT: control target
= control target key end

     0   :  { %10 = vsyncpa [#allocation3], 0  ;;  %s588_s0 = inlined_call_operand.vmem [shape: f32[8,128], index: 0, kind: input, shape index: {}]   ;;  %s589_s1 = inlined_call_operand.hbm [shape: f32[128,128], index: 1, kind: input, shape index: {}]   ;;  %s590_s2 = inlined_call_operand.vmem [shape: f32[1,128], index: 2, kind: input, shape index: {}]   ;;  %s591_s3 = inlined_call_operand.hbm [shape: f32[128,128], index: 3, kind: input, shape index: {}]   ;;  %s592_s4 = inlined_call_operand.vmem [shape: f32[1,128], index: 4, kind: input, shape index: {}]   ;;  %s593_s5 = inlined_call_operand.hbm [shape: f32[8,128], index: 5, kind: output, shape index: {}]  }
   0x1   :  { %11 = vsyncpa [#allocation6], 0 }
   0x2   :  { %12 = vsyncpa [#allocation4], 0  ;;  %s489_s18 = smov [#allocation2]   ;;  %s417_s22 = scalar_lea.hbm %s589_s1, 2048 }
   0x3   :  { %s20_s19 = sshll.u32 %s489_s18, 4  ;;  %p418_p0 = scmp.ne.s32.totalorder %s589_s1, %s417_s22  ;;  %s21_s19 = int_to_ptr.vmem [resolvable:$true] %s20_s19 }
   0x4   :  { %p421_p1 = scmp.lt.u32.totalorder %s417_s22, %s589_s1 }
   0x6   :  { %p423_p2 = pnand %p421_p1, %p418_p0 }
   0x8   :  { %426 = shalt.err (!%p423_p2)
}
   0x9   :  { %s427_s27 = scalar_lea.vmem %s21_s19, 2048  ;;  %p432_p4 = scmp.lt.s32.totalorder %s21_s19, %s21_s19 }
   0xa   :  { %p428_p3 = scmp.ne.s32.totalorder %s21_s19, %s427_s27  ;;  %p433_p5 = scmp.lt.s32.totalorder %s427_s27, %s427_s27 }
   0xc   :  { %p434_p6 = por %p433_p5, %p432_p4 }
   0xe   :  { %p435_p7 = pnand %p434_p6, %p428_p3 }
  0x10   :  { %438 = shalt.err (!%p435_p7)
}
  0x11   :  { %s490_s28 = smov 128   ;;  %s491_s29 = smov 8  }
  0x12   :  { %26 = dma.hbm_to_vmem [thread:$0]  %s589_s1, 2048, %s21_s19, [#allocation3], %s490_s28, %s490_s28, %s491_s29  }
  0x13   :  { %s492_s7 = smov [#allocation5]   ;;  %s439_s11 = scalar_lea.hbm %s591_s3, 2048 }
  0x14   :  { %s34_s8 = sshll.u32 %s492_s7, 4  ;;  %p440_p8 = scmp.ne.s32.totalorder %s591_s3, %s439_s11  ;;  %s35_s8 = int_to_ptr.vmem [resolvable:$true] %s34_s8 }
  0x15   :  { %p443_p9 = scmp.lt.u32.totalorder %s439_s11, %s591_s3 }
  0x17   :  { %p445_p10 = pnand %p443_p9, %p440_p8 }
  0x19   :  { %448 = shalt.err (!%p445_p10)
}
  0x1a   :  { %s449_s16 = scalar_lea.vmem %s35_s8, 2048  ;;  %p454_p12 = scmp.lt.s32.totalorder %s35_s8, %s35_s8 }
  0x1b   :  { %p450_p11 = scmp.ne.s32.totalorder %s35_s8, %s449_s16  ;;  %p455_p13 = scmp.lt.s32.totalorder %s449_s16, %s449_s16 }
  0x1d   :  { %p456_p0 = por %p455_p13, %p454_p12 }
  0x1f   :  { %p457_p1 = pnand %p456_p0, %p450_p11 }
  0x21   :  { %460 = shalt.err (!%p457_p1)
}
  0x22   :  { %40 = dma.hbm_to_vmem [thread:$0]  %s591_s3, 2048, %s35_s8, [#allocation6], %s490_s28, %s490_s28, %s491_s29  }
  0x23   :  { %483 = dma.done.wait [#allocation3], 2048  }
  0x24   :  { %484 = vsyncadd [#allocation3], 4294965248 }
  0x25   :  { %485 = dma.done.wait [#allocation6], 2048  }
  0x26   :  { %486 = vsyncadd [#allocation6], 4294965248  ;;  %v493_v0 = vmov 0.0|0.0   ;;  %vm494_vm0 = vmmov 0   ;;  %v495_v1 = vmov 0.0   ;;  %v50_v2 = vld [vmem:[#allocation2] sm:$0xff] }
  0x27   :  { %361 = vmatprep.subr.bf16.mxu0 %v493_v0  ;;  %323 = vmatprep.mubr.msk.f32.mxu0 %vm494_vm0, %v495_v1  ;;  %v51_v3 = vld [vmem:[#allocation2 + $0x8] sm:$0xff]  ;;  %v52_v4 = vld [vmem:[#allocation2 + $0x10] sm:$0xff]  ;;  %v53_v6 = vld [vmem:[#allocation2 + $0x18] sm:$0xff] }
  0x28   :  { %385 = vmatprep.subr.bf16.mxu1 %v493_v0  ;;  %358 = vmatprep.mubr.msk.f32.mxu1 %vm494_vm0, %v495_v1  ;;  %v362_v5 = vpack.c.bf16 %v51_v3, %v50_v2  ;;  %v365_v7 = vpack.c.bf16 %v53_v6, %v52_v4  ;;  %v54_v8 = vld [vmem:[#allocation2 + $0x20] sm:$0xff]  ;;  %v55_v9 = vld [vmem:[#allocation2 + $0x28] sm:$0xff]  ;;  %v146_v12 = vld [vmem:[#allocation5 + $0x10] sm:$0xff] }
  0x29   :  { %v144_v10 = vld [vmem:[#allocation5] sm:$0xff]  ;;  %v145_v11 = vld [vmem:[#allocation5 + $0x8] sm:$0xff]  ;;  %v147_v13 = vld [vmem:[#allocation5 + $0x18] sm:$0xff]  ;;  %v368_v14 = vpack.c.bf16 %v55_v9, %v54_v8 }
  0x2a   :  { %363 = vmatpush3.bf16.msra.mxu0 %v362_v5  ;;  %v386_v15 = vpack.c.bf16 %v145_v11, %v144_v10  ;;  %v56_v16 = vld [vmem:[#allocation2 + $0x30] sm:$0xff]  ;;  %v57_v17 = vld [vmem:[#allocation2 + $0x38] sm:$0xff]  ;;  %v389_v18 = vpack.c.bf16 %v147_v13, %v146_v12  ;;  %v148_v19 = vld [vmem:[#allocation5 + $0x20] sm:$0xff] }
  0x2b   :  { %364 = vmatprep.subr.bf16.mxu0 %v493_v0  ;;  %v149_v20 = vld [vmem:[#allocation5 + $0x28] sm:$0xff]  ;;  %v371_v21 = vpack.c.bf16 %v57_v17, %v56_v16  ;;  %v58_v22 = vld [vmem:[#allocation2 + $0x40] sm:$0xff]  ;;  %v150_v25 = vld [vmem:[#allocation5 + $0x30] sm:$0xff] }
  0x2c   :  { %387 = vmatpush3.bf16.msra.mxu1 %v386_v15  ;;  %v59_v23 = vld [vmem:[#allocation2 + $0x48] sm:$0xff]  ;;  %v392_v24 = vpack.c.bf16 %v149_v20, %v148_v19  ;;  %v151_v26 = vld [vmem:[#allocation5 + $0x38] sm:$0xff]  ;;  %v60_v28 = vld [vmem:[#allocation2 + $0x50] sm:$0xff] }
  0x2d   :  { %388 = vmatprep.subr.bf16.mxu1 %v493_v0  ;;  %v374_v27 = vpack.c.bf16 %v59_v23, %v58_v22  ;;  %v61_v29 = vld [vmem:[#allocation2 + $0x58] sm:$0xff]  ;;  %v395_v30 = vpack.c.bf16 %v151_v26, %v150_v25  ;;  %v152_v31 = vld [vmem:[#allocation5 + $0x40] sm:$0xff]  ;;  %v153_v32 = vld [vmem:[#allocation5 + $0x48] sm:$0xff] }
  0x2e   :  { %366 = vmatpush3.bf16.msra.mxu0 %v365_v7  ;;  %v377_v33 = vpack.c.bf16 %v61_v29, %v60_v28  ;;  %v62_v34 = vld [vmem:[#allocation2 + $0x60] sm:$0xff]  ;;  %v63_v35 = vld [vmem:[#allocation2 + $0x68] sm:$0xff]  ;;  %v398_v36 = vpack.c.bf16 %v153_v32, %v152_v31  ;;  %v154_v37 = vld [vmem:[#allocation5 + $0x50] sm:$0xff] }
  0x2f   :  { %367 = vmatprep.subr.bf16.mxu0 %v493_v0  ;;  %v155_v38 = vld [vmem:[#allocation5 + $0x58] sm:$0xff]  ;;  %v380_v39 = vpack.c.bf16 %v63_v35, %v62_v34  ;;  %v64_v40 = vld [vmem:[#allocation2 + $0x70] sm:$0xff]  ;;  %v156_v43 = vld [vmem:[#allocation5 + $0x60] sm:$0xff] }
  0x30   :  { %390 = vmatpush3.bf16.msra.mxu1 %v389_v18  ;;  %v65_v41 = vld [vmem:[#allocation2 + $0x78] sm:$0xff]  ;;  %v401_v42 = vpack.c.bf16 %v155_v38, %v154_v37  ;;  %v157_v44 = vld [vmem:[#allocation5 + $0x68] sm:$0xff]  ;;  %v158_v48 = vld [vmem:[#allocation5 + $0x70] sm:$0xff] }
  0x31   :  { %391 = vmatprep.subr.bf16.mxu1 %v493_v0  ;;  %v383_v45 = vpack.c.bf16 %v65_v41, %v64_v40  ;;  %v404_v46 = vpack.c.bf16 %v157_v44, %v156_v43  ;;  %v49_v47 = vld [vmem:[%s588_s0] sm:$0xff]  ;;  %s496_s0 = smov [#allocation7]  }
  0x32   :  { %369 = vmatpush3.bf16.msra.mxu0 %v368_v14  ;;  %v159_v49 = vld [vmem:[#allocation5 + $0x78] sm:$0xff]  ;;  %s245_s23 = sshll.u32 %s496_s0, 4  ;;  %s246_s23 = int_to_ptr.vmem [resolvable:$true] %s245_s23 }
  0x33   :  { %370 = vmatprep.subr.bf16.mxu0 %v493_v0  ;;  %v407_v50 = vpack.c.bf16 %v159_v49, %v158_v48  ;;  %v255_v51 = vld [vmem:[%s590_s2] ss:$0 sm:$0xff]  ;;  %s461_s24 = scalar_lea.vmem %s246_s23, 128  ;;  %p466_p3 = scmp.lt.s32.totalorder %s246_s23, %s246_s23 }
  0x34   :  { %393 = vmatpush3.bf16.msra.mxu1 %v392_v24  ;;  %v256_v56 = vld [vmem:[%s592_s4] ss:$0 sm:$0xff]  ;;  %p462_p2 = scmp.ne.s32.totalorder %s246_s23, %s461_s24  ;;  %p467_p4 = scmp.lt.s32.totalorder %s461_s24, %s461_s24 }
  0x35   :  { %394 = vmatprep.subr.bf16.mxu1 %v493_v0 }
  0x36   :  { %372 = vmatpush3.bf16.msra.mxu0 %v371_v21  ;;  %p468_p5 = por %p467_p4, %p466_p3 }
  0x37   :  { %373 = vmatprep.subr.bf16.mxu0 %v493_v0 }
  0x38   :  { %396 = vmatpush3.bf16.msra.mxu1 %v395_v30  ;;  %p469_p6 = pnand %p468_p5, %p462_p2 }
  0x39   :  { %397 = vmatprep.subr.bf16.mxu1 %v493_v0 }
  0x3a   :  { %375 = vmatpush3.bf16.msra.mxu0 %v374_v27 }
  0x3b   :  { %376 = vmatprep.subr.bf16.mxu0 %v493_v0 }
  0x3c   :  { %399 = vmatpush3.bf16.msra.mxu1 %v398_v36 }
  0x3d   :  { %400 = vmatprep.subr.bf16.mxu1 %v493_v0 }
  0x3e   :  { %378 = vmatpush3.bf16.msra.mxu0 %v377_v33 }
  0x3f   :  { %379 = vmatprep.subr.bf16.mxu0 %v493_v0 }
  0x40   :  { %402 = vmatpush3.bf16.msra.mxu1 %v401_v42 }
  0x41   :  { %403 = vmatprep.subr.bf16.mxu1 %v493_v0 }
  0x42   :  { %381 = vmatpush3.bf16.msra.mxu0 %v380_v39 }
  0x43   :  { %382 = vmatprep.subr.bf16.mxu0 %v493_v0 }
  0x44   :  { %405 = vmatpush3.bf16.msra.mxu1 %v404_v46 }
  0x45   :  { %406 = vmatprep.subr.bf16.mxu1 %v493_v0 }
  0x46   :  { %384 = vmatpush3.bf16.msra.mxu0 %v383_v45 }
  0x48   :  { %408 = vmatpush3.bf16.msra.mxu1 %v407_v50 }
  0x49   :  { %324 = vmatmul.mubr.f32.vlgmr.msra.gmra.mrb[0].mxu0 %v49_v47 }
 0x11c   :  { %v139_v52 = vpop.f32.mrb[0].mxu0 }
 0x11d   :  { %v140_v53 = vadd.f32 %v255_v51, %v139_v52  ;;  %v325_v54 = vpop.f32.mrb[1].mxu0 }
 0x11f   :  { %v143_v55 = vmax.f32 %v140_v53, 0.0 }
 0x121   :  { %359 = vmatmul.mubr.f32.vlgmr.msra.gmra.mrb[0].mxu1 %v143_v55 }
 0x1f4   :  { %v233_v57 = vpop.f32.mrb[0].mxu1 }
 0x1f5   :  { %v234_v58 = vadd.f32 %v256_v56, %v233_v57  ;;  %v360_v59 = vpop.f32.mrb[1].mxu1 }
 0x1f7   :  { %v237_v60 = vmax.f32 %v234_v58, 0.0 }
 0x1f9   :  { %238 = vst [vmem:[#allocation7] sm:$0xff] %v237_v60 }
 0x1fa   :  { %472 = shalt.err (!%p469_p6)
}
 0x1fb   :  { %s473_s26 = scalar_lea.hbm %s593_s5, 128 }
 0x1fc   :  { %p474_p7 = scmp.ne.s32.totalorder %s593_s5, %s473_s26  ;;  %p477_p8 = scmp.lt.u32.totalorder %s473_s26, %s593_s5 }
 0x1fe   :  { %p479_p9 = pnand %p477_p8, %p474_p7 }
 0x200   :  { %482 = shalt.err (!%p479_p9)
}
 0x201   :  { %248 = dma.vmem_to_hbm [thread:$0]  %s246_s23, 128, %s593_s5, [#allocation4]  }
 0x202   :  { %487 = dma.done.wait [#allocation4], 128  }
 0x203   :  { %488 = vsyncadd [#allocation4], 4294967168 }
 0x204   :  { %252 = vsyncpa [#allocation3], 1 }
 0x205   :  { %253 = vsyncpa [#allocation6], 1 }
 0x206   :  { %254 = vsyncpa [#allocation4], 1 }

// kernel: apply.1
= control target key start
LH: loop header
LB: loop body
LE: loop exit
PB: predicated region body
PF: predicated region fallthrough
CT: control target
= control target key end

     0   :  { %10 = vsyncpa [#allocation3], 0  ;;  %s588_s0 = inlined_call_operand.vmem [shape: f32[8,128], index: 0, kind: input, shape index: {}]   ;;  %s589_s1 = inlined_call_operand.hbm [shape: f32[128,128], index: 1, kind: input, shape index: {}]   ;;  %s590_s2 = inlined_call_operand.vmem [shape: f32[1,128], index: 2, kind: input, shape index: {}]   ;;  %s591_s3 = inlined_call_operand.hbm [shape: f32[128,128], index: 3, kind: input, shape index: {}]   ;;  %s592_s4 = inlined_call_operand.vmem [shape: f32[1,128], index: 4, kind: input, shape index: {}]   ;;  %s593_s5 = inlined_call_operand.hbm [shape: f32[8,128], index: 5, kind: output, shape index: {}]  }
   0x1   :  { %11 = vsyncpa [#allocation6], 0 }
   0x2   :  { %12 = vsyncpa [#allocation4], 0  ;;  %s489_s18 = smov [#allocation2]   ;;  %s417_s22 = scalar_lea.hbm %s589_s1, 2048 }
   0x3   :  { %s20_s19 = sshll.u32 %s489_s18, 4  ;;  %p418_p0 = scmp.ne.s32.totalorder %s589_s1, %s417_s22  ;;  %s21_s19 = int_to_ptr.vmem [resolvable:$true] %s20_s19 }
   0x4   :  { %p421_p1 = scmp.lt.u32.totalorder %s417_s22, %s589_s1 }
   0x6   :  { %p423_p2 = pnand %p421_p1, %p418_p0 }
   0x8   :  { %426 = shalt.err (!%p423_p2)
}
   0x9   :  { %s427_s27 = scalar_lea.vmem %s21_s19, 2048  ;;  %p432_p4 = scmp.lt.s32.totalorder %s21_s19, %s21_s19 }
   0xa   :  { %p428_p3 = scmp.ne.s32.totalorder %s21_s19, %s427_s27  ;;  %p433_p5 = scmp.lt.s32.totalorder %s427_s27, %s427_s27 }
   0xc   :  { %p434_p6 = por %p433_p5, %p432_p4 }
   0xe   :  { %p435_p7 = pnand %p434_p6, %p428_p3 }
  0x10   :  { %438 = shalt.err (!%p435_p7)
}
  0x11   :  { %s490_s28 = smov 128   ;;  %s491_s29 = smov 8  }
  0x12   :  { %26 = dma.hbm_to_vmem [thread:$0]  %s589_s1, 2048, %s21_s19, [#allocation3], %s490_s28, %s490_s28, %s491_s29  }
  0x13   :  { %s492_s7 = smov [#allocation5]   ;;  %s439_s11 = scalar_lea.hbm %s591_s3, 2048 }
  0x14   :  { %s34_s8 = sshll.u32 %s492_s7, 4  ;;  %p440_p8 = scmp.ne.s32.totalorder %s591_s3, %s439_s11  ;;  %s35_s8 = int_to_ptr.vmem [resolvable:$true] %s34_s8 }
  0x15   :  { %p443_p9 = scmp.lt.u32.totalorder %s439_s11, %s591_s3 }
  0x17   :  { %p445_p10 = pnand %p443_p9, %p440_p8 }
  0x19   :  { %448 = shalt.err (!%p445_p10)
}
  0x1a   :  { %s449_s16 = scalar_lea.vmem %s35_s8, 2048  ;;  %p454_p12 = scmp.lt.s32.totalorder %s35_s8, %s35_s8 }
  0x1b   :  { %p450_p11 = scmp.ne.s32.totalorder %s35_s8, %s449_s16  ;;  %p455_p13 = scmp.lt.s32.totalorder %s449_s16, %s449_s16 }
  0x1d   :  { %p456_p0 = por %p455_p13, %p454_p12 }
  0x1f   :  { %p457_p1 = pnand %p456_p0, %p450_p11 }
  0x21   :  { %460 = shalt.err (!%p457_p1)
}
  0x22   :  { %40 = dma.hbm_to_vmem [thread:$0]  %s591_s3, 2048, %s35_s8, [#allocation6], %s490_s28, %s490_s28, %s491_s29  }
  0x23   :  { %483 = dma.done.wait [#allocation3], 2048  }
  0x24   :  { %484 = vsyncadd [#allocation3], 4294965248 }
  0x25   :  { %485 = dma.done.wait [#allocation6], 2048  }
  0x26   :  { %486 = vsyncadd [#allocation6], 4294965248  ;;  %v493_v0 = vmov 0.0|0.0   ;;  %vm494_vm0 = vmmov 0   ;;  %v495_v1 = vmov 0.0   ;;  %v50_v2 = vld [vmem:[#allocation2] sm:$0xff] }
  0x27   :  { %361 = vmatprep.subr.bf16.mxu0 %v493_v0  ;;  %323 = vmatprep.mubr.msk.f32.mxu0 %vm494_vm0, %v495_v1  ;;  %v51_v3 = vld [vmem:[#allocation2 + $0x8] sm:$0xff]  ;;  %v52_v4 = vld [vmem:[#allocation2 + $0x10] sm:$0xff]  ;;  %v53_v6 = vld [vmem:[#allocation2 + $0x18] sm:$0xff] }
  0x28   :  { %385 = vmatprep.subr.bf16.mxu1 %v493_v0  ;;  %358 = vmatprep.mubr.msk.f32.mxu1 %vm494_vm0, %v495_v1  ;;  %v362_v5 = vpack.c.bf16 %v51_v3, %v50_v2  ;;  %v365_v7 = vpack.c.bf16 %v53_v6, %v52_v4  ;;  %v54_v8 = vld [vmem:[#allocation2 + $0x20] sm:$0xff]  ;;  %v55_v9 = vld [vmem:[#allocation2 + $0x28] sm:$0xff]  ;;  %v146_v12 = vld [vmem:[#allocation5 + $0x10] sm:$0xff] }
  0x29   :  { %v144_v10 = vld [vmem:[#allocation5] sm:$0xff]  ;;  %v145_v11 = vld [vmem:[#allocation5 + $0x8] sm:$0xff]  ;;  %v147_v13 = vld [vmem:[#allocation5 + $0x18] sm:$0xff]  ;;  %v368_v14 = vpack.c.bf16 %v55_v9, %v54_v8 }
  0x2a   :  { %363 = vmatpush3.bf16.msra.mxu0 %v362_v5  ;;  %v386_v15 = vpack.c.bf16 %v145_v11, %v144_v10  ;;  %v56_v16 = vld [vmem:[#allocation2 + $0x30] sm:$0xff]  ;;  %v57_v17 = vld [vmem:[#allocation2 + $0x38] sm:$0xff]  ;;  %v389_v18 = vpack.c.bf16 %v147_v13, %v146_v12  ;;  %v148_v19 = vld [vmem:[#allocation5 + $0x20] sm:$0xff] }
  0x2b   :  { %364 = vmatprep.subr.bf16.mxu0 %v493_v0  ;;  %v149_v20 = vld [vmem:[#allocation5 + $0x28] sm:$0xff]  ;;  %v371_v21 = vpack.c.bf16 %v57_v17, %v56_v16  ;;  %v58_v22 = vld [vmem:[#allocation2 + $0x40] sm:$0xff]  ;;  %v150_v25 = vld [vmem:[#allocation5 + $0x30] sm:$0xff] }
  0x2c   :  { %387 = vmatpush3.bf16.msra.mxu1 %v386_v15  ;;  %v59_v23 = vld [vmem:[#allocation2 + $0x48] sm:$0xff]  ;;  %v392_v24 = vpack.c.bf16 %v149_v20, %v148_v19  ;;  %v151_v26 = vld [vmem:[#allocation5 + $0x38] sm:$0xff]  ;;  %v60_v28 = vld [vmem:[#allocation2 + $0x50] sm:$0xff] }
  0x2d   :  { %388 = vmatprep.subr.bf16.mxu1 %v493_v0  ;;  %v374_v27 = vpack.c.bf16 %v59_v23, %v58_v22  ;;  %v61_v29 = vld [vmem:[#allocation2 + $0x58] sm:$0xff]  ;;  %v395_v30 = vpack.c.bf16 %v151_v26, %v150_v25  ;;  %v152_v31 = vld [vmem:[#allocation5 + $0x40] sm:$0xff]  ;;  %v153_v32 = vld [vmem:[#allocation5 + $0x48] sm:$0xff] }
  0x2e   :  { %366 = vmatpush3.bf16.msra.mxu0 %v365_v7  ;;  %v377_v33 = vpack.c.bf16 %v61_v29, %v60_v28  ;;  %v62_v34 = vld [vmem:[#allocation2 + $0x60] sm:$0xff]  ;;  %v63_v35 = vld [vmem:[#allocation2 + $0x68] sm:$0xff]  ;;  %v398_v36 = vpack.c.bf16 %v153_v32, %v152_v31  ;;  %v154_v37 = vld [vmem:[#allocation5 + $0x50] sm:$0xff] }
  0x2f   :  { %367 = vmatprep.subr.bf16.mxu0 %v493_v0  ;;  %v155_v38 = vld [vmem:[#allocation5 + $0x58] sm:$0xff]  ;;  %v380_v39 = vpack.c.bf16 %v63_v35, %v62_v34  ;;  %v64_v40 = vld [vmem:[#allocation2 + $0x70] sm:$0xff]  ;;  %v156_v43 = vld [vmem:[#allocation5 + $0x60] sm:$0xff] }
  0x30   :  { %390 = vmatpush3.bf16.msra.mxu1 %v389_v18  ;;  %v65_v41 = vld [vmem:[#allocation2 + $0x78] sm:$0xff]  ;;  %v401_v42 = vpack.c.bf16 %v155_v38, %v154_v37  ;;  %v157_v44 = vld [vmem:[#allocation5 + $0x68] sm:$0xff]  ;;  %v158_v48 = vld [vmem:[#allocation5 + $0x70] sm:$0xff] }
  0x31   :  { %391 = vmatprep.subr.bf16.mxu1 %v493_v0  ;;  %v383_v45 = vpack.c.bf16 %v65_v41, %v64_v40  ;;  %v404_v46 = vpack.c.bf16 %v157_v44, %v156_v43  ;;  %v49_v47 = vld [vmem:[%s588_s0] sm:$0xff]  ;;  %s496_s0 = smov [#allocation7]  }
  0x32   :  { %369 = vmatpush3.bf16.msra.mxu0 %v368_v14  ;;  %v159_v49 = vld [vmem:[#allocation5 + $0x78] sm:$0xff]  ;;  %s245_s23 = sshll.u32 %s496_s0, 4  ;;  %s246_s23 = int_to_ptr.vmem [resolvable:$true] %s245_s23 }
  0x33   :  { %370 = vmatprep.subr.bf16.mxu0 %v493_v0  ;;  %v407_v50 = vpack.c.bf16 %v159_v49, %v158_v48  ;;  %v255_v51 = vld [vmem:[%s590_s2] ss:$0 sm:$0xff]  ;;  %s461_s24 = scalar_lea.vmem %s246_s23, 128  ;;  %p466_p3 = scmp.lt.s32.totalorder %s246_s23, %s246_s23 }
  0x34   :  { %393 = vmatpush3.bf16.msra.mxu1 %v392_v24  ;;  %v256_v56 = vld [vmem:[%s592_s4] ss:$0 sm:$0xff]  ;;  %p462_p2 = scmp.ne.s32.totalorder %s246_s23, %s461_s24  ;;  %p467_p4 = scmp.lt.s32.totalorder %s461_s24, %s461_s24 }
  0x35   :  { %394 = vmatprep.subr.bf16.mxu1 %v493_v0 }
  0x36   :  { %372 = vmatpush3.bf16.msra.mxu0 %v371_v21  ;;  %p468_p5 = por %p467_p4, %p466_p3 }
  0x37   :  { %373 = vmatprep.subr.bf16.mxu0 %v493_v0 }
  0x38   :  { %396 = vmatpush3.bf16.msra.mxu1 %v395_v30  ;;  %p469_p6 = pnand %p468_p5, %p462_p2 }
  0x39   :  { %397 = vmatprep.subr.bf16.mxu1 %v493_v0 }
  0x3a   :  { %375 = vmatpush3.bf16.msra.mxu0 %v374_v27 }
  0x3b   :  { %376 = vmatprep.subr.bf16.mxu0 %v493_v0 }
  0x3c   :  { %399 = vmatpush3.bf16.msra.mxu1 %v398_v36 }
  0x3d   :  { %400 = vmatprep.subr.bf16.mxu1 %v493_v0 }
  0x3e   :  { %378 = vmatpush3.bf16.msra.mxu0 %v377_v33 }
  0x3f   :  { %379 = vmatprep.subr.bf16.mxu0 %v493_v0 }
  0x40   :  { %402 = vmatpush3.bf16.msra.mxu1 %v401_v42 }
  0x41   :  { %403 = vmatprep.subr.bf16.mxu1 %v493_v0 }
  0x42   :  { %381 = vmatpush3.bf16.msra.mxu0 %v380_v39 }
  0x43   :  { %382 = vmatprep.subr.bf16.mxu0 %v493_v0 }
  0x44   :  { %405 = vmatpush3.bf16.msra.mxu1 %v404_v46 }
  0x45   :  { %406 = vmatprep.subr.bf16.mxu1 %v493_v0 }
  0x46   :  { %384 = vmatpush3.bf16.msra.mxu0 %v383_v45 }
  0x48   :  { %408 = vmatpush3.bf16.msra.mxu1 %v407_v50 }
  0x49   :  { %324 = vmatmul.mubr.f32.vlgmr.msra.gmra.mrb[0].mxu0 %v49_v47 }
 0x11c   :  { %v139_v52 = vpop.f32.mrb[0].mxu0 }
 0x11d   :  { %v140_v53 = vadd.f32 %v255_v51, %v139_v52  ;;  %v325_v54 = vpop.f32.mrb[1].mxu0 }
 0x11f   :  { %v143_v55 = vmax.f32 %v140_v53, 0.0 }
 0x121   :  { %359 = vmatmul.mubr.f32.vlgmr.msra.gmra.mrb[0].mxu1 %v143_v55 }
 0x1f4   :  { %v233_v57 = vpop.f32.mrb[0].mxu1 }
 0x1f5   :  { %v234_v58 = vadd.f32 %v256_v56, %v233_v57  ;;  %v360_v59 = vpop.f32.mrb[1].mxu1 }
 0x1f7   :  { %v237_v60 = vmax.f32 %v234_v58, 0.0 }
 0x1f9   :  { %238 = vst [vmem:[#allocation7] sm:$0xff] %v237_v60 }
 0x1fa   :  { %472 = shalt.err (!%p469_p6)
}
 0x1fb   :  { %s473_s26 = scalar_lea.hbm %s593_s5, 128 }
 0x1fc   :  { %p474_p7 = scmp.ne.s32.totalorder %s593_s5, %s473_s26  ;;  %p477_p8 = scmp.lt.u32.totalorder %s473_s26, %s593_s5 }
 0x1fe   :  { %p479_p9 = pnand %p477_p8, %p474_p7 }
 0x200   :  { %482 = shalt.err (!%p479_p9)
}
 0x201   :  { %248 = dma.vmem_to_hbm [thread:$0]  %s246_s23, 128, %s593_s5, [#allocation4]  }
 0x202   :  { %487 = dma.done.wait [#allocation4], 128  }
 0x203   :  { %488 = vsyncadd [#allocation4], 4294967168 }
 0x204   :  { %252 = vsyncpa [#allocation3], 1 }
 0x205   :  { %253 = vsyncpa [#allocation6], 1 }
 0x206   :  { %254 = vsyncpa [#allocation4], 1 }

</bundles_post_ra>
